<compile_context>
chip_gen: v7x
topology: tpu7x:2x2x1
jax: 0.10.0
libtpu: 0.0.40
codegen_flags: <defaults>
</compile_context>

<pallas_src>
import jax
import jax.numpy as jnp
from jax.experimental import pallas as pl
from jax.experimental.pallas import tpu as pltpu


def _round_up(v, m):
    return ((v + m - 1) // m) * m


def _pad2(a, rows, cols):
    return jnp.pad(a, ((0, rows - a.shape[0]), (0, cols - a.shape[1])))


def _pick_tile(extent, cap):
    """Largest multiple of 128 that divides `extent` (itself a multiple of 128)
    and is <= cap.  Guarantees full grid coverage with zero extra padding."""
    best = 128
    t = 128
    top = min(cap, extent)
    while t <= top:
        if extent % t == 0:
            best = t
        t += 128
    return best


def _make_kernel(tk, x_resident):
    def kernel(a_ref, xk_ref, xm_ref, invdeg_ref, wl_ref, bl_ref, wr_ref,
               wfc_ref, bfc_ref, out_ref, acc_ref):
        k = pl.program_id(1)

        @pl.when(k == 0)
        def _init():
            acc_ref[...] = jnp.zeros_like(acc_ref)

        if x_resident:
            # Whole X (agg view) lives in VMEM; slice the current K chunk.
            start = pl.multiple_of(k * tk, tk)
            xk = xk_ref[pl.ds(start, tk), :]
        else:
            xk = xk_ref[...]

        # Dominant matmul: native bf16 x bf16 on the MXU, f32 accumulation.
        # A stores exact 0/1/edge-count values, so the neighbor SUM is exact.
        acc_ref[...] += jnp.dot(a_ref[...], xk,
                                preferred_element_type=jnp.float32)

        @pl.when(k == pl.num_programs(1) - 1)
        def _finalize():
            # Mean aggregation: scale accumulated neighbor sum by 1/deg (VPU).
            agg = acc_ref[...] * invdeg_ref[...]                    # (TM, Fp)
            # SAGEConv: lin_l(agg) + bias + lin_r(x_root) (lin_r has no bias).
            h = jnp.dot(agg, wl_ref[...],
                        preferred_element_type=jnp.float32) + bl_ref[...]
            h = h + jnp.dot(xm_ref[...], wr_ref[...],
                            preferred_element_type=jnp.float32)
            h = jnp.maximum(h, 0.0)                                 # ReLU
            out_ref[...] = (
                jnp.dot(h, wfc_ref[...], preferred_element_type=jnp.float32)
                + bfc_ref[...]
            )

    return kernel


def sage_mlc_forward(x, edge_index, params):
    """x: [N, F] float32, edge_index: [2, E] int32, params: dict of weights."""
    n, f = x.shape
    h = params["wl"].shape[1]
    c = params["wfc"].shape[1]

    src = edge_index[0]
    dst = edge_index[1]

    # Glue (outside the kernel): dense UNNORMALIZED adjacency (edge counts);
    # 1/deg is applied inside the kernel after the A@X accumulation so A can be
    # stored exactly in bf16.
    adj = jnp.zeros((n, n), dtype=jnp.float32).at[dst, src].add(1.0)
    deg = jnp.sum(adj, axis=1, keepdims=True)
    inv_deg = jnp.where(deg > 0.0, 1.0 / jnp.maximum(deg, 1.0), 0.0)

    # ---- tile sizes & padded extents -------------------------------------
    n128 = _round_up(n, 128)
    tm = _pick_tile(n128, 1024)     # row tile (output / parallel axis)
    tk = _pick_tile(n128, 2048)     # reduction tile over A's columns
    n_rows = n128                   # multiple of tm (rows of A / X / out)
    n_cols = n128                   # multiple of tk (cols of A, rows of agg-X)
    f_pad = _round_up(f, 128)
    h_pad = _round_up(h, 128)
    c_pad = _round_up(c, 128)

    # ---- zero-padded, lane-dense operands --------------------------------
    adj_p = _pad2(adj, n_rows, n_cols).astype(jnp.bfloat16)   # dominant stream
    xk_p = _pad2(x, n_cols, f_pad).astype(jnp.bfloat16)       # agg operand
    xm_p = _pad2(x, n_rows, f_pad).astype(jnp.float32)        # root term (f32)
    inv_deg_p = _pad2(inv_deg, n_rows, 1).astype(jnp.float32)
    wl_p = _pad2(params["wl"], f_pad, h_pad).astype(jnp.float32)
    bl_p = _pad2(params["bl"], 1, h_pad).astype(jnp.float32)
    wr_p = _pad2(params["wr"], f_pad, h_pad).astype(jnp.float32)
    wfc_p = _pad2(params["wfc"], h_pad, c_pad).astype(jnp.float32)
    bfc_p = _pad2(params["bfc"], 1, c_pad).astype(jnp.float32)

    grid = (n_rows // tm, n_cols // tk)

    # Hold the K-tiled X fully VMEM-resident when small enough: HBM streams it
    # exactly once instead of once per row tile.
    x_resident = (n_cols * f_pad * 2) <= (8 * 1024 * 1024)
    if x_resident:
        xk_spec = pl.BlockSpec((n_cols, f_pad), lambda i, k: (0, 0))
        xk_hbm_passes = 1
    else:
        xk_spec = pl.BlockSpec((tk, f_pad), lambda i, k: (k, 0))
        xk_hbm_passes = grid[0]

    flops = (2 * n_rows * n_cols * f_pad          # A @ X
             + 4 * n_rows * f_pad * h_pad         # agg@Wl + x@Wr
             + 2 * n_rows * h_pad * c_pad)        # h @ Wfc
    bytes_accessed = (
        adj_p.size * 2                             # bf16 A, streamed once
        + xk_hbm_passes * xk_p.size * 2            # bf16 X (agg view)
        + xm_p.size * 4                            # f32 X (root view), once
        + inv_deg_p.size * 4
        + (wl_p.size + wr_p.size + wfc_p.size + bl_p.size + bfc_p.size) * 4
        + n_rows * c_pad * 4)                      # output

    kernel = _make_kernel(tk, x_resident)

    out = pl.pallas_call(
        kernel,
        out_shape=jax.ShapeDtypeStruct((n_rows, c_pad), jnp.float32),
        grid_spec=pltpu.PrefetchScalarGridSpec(
            num_scalar_prefetch=0,
            grid=grid,
            in_specs=[
                # A tile: rows follow i, columns follow the reduction axis k.
                pl.BlockSpec((tm, tk), lambda i, k: (i, k)),
                # X for aggregation (resident or K-streamed), bf16.
                xk_spec,
                # X tiled along M (root features for lin_r) — constant over k.
                pl.BlockSpec((tm, f_pad), lambda i, k: (i, 0)),
                # 1/deg per output row — constant over k.
                pl.BlockSpec((tm, 1), lambda i, k: (i, 0)),
                # Weights / biases: resident, DMA'd once (constant index maps).
                pl.BlockSpec((f_pad, h_pad), lambda i, k: (0, 0)),   # Wl
                pl.BlockSpec((1, h_pad), lambda i, k: (0, 0)),       # bl
                pl.BlockSpec((f_pad, h_pad), lambda i, k: (0, 0)),   # Wr
                pl.BlockSpec((h_pad, c_pad), lambda i, k: (0, 0)),   # Wfc
                pl.BlockSpec((1, c_pad), lambda i, k: (0, 0)),       # bfc
            ],
            out_specs=pl.BlockSpec((tm, c_pad), lambda i, k: (i, 0)),
            scratch_shapes=[pltpu.VMEM((tm, f_pad), jnp.float32)],   # A@X acc
        ),
        compiler_params=pltpu.CompilerParams(
            dimension_semantics=("parallel", "arbitrary"),
            vmem_limit_bytes=48 * 1024 * 1024,
        ),
        cost_estimate=pl.CostEstimate(
            flops=flops, transcendentals=0, bytes_accessed=bytes_accessed),
    )(adj_p, xk_p, xm_p, inv_deg_p, wl_p, bl_p, wr_p, wfc_p, bfc_p)

    return out[:n, :c]


def reference_forward(x, edge_index, params):
    n = x.shape[0]
    src, dst = edge_index[0], edge_index[1]
    adj = jnp.zeros((n, n), dtype=jnp.float32).at[dst, src].add(1.0)
    deg = jnp.sum(adj, axis=1, keepdims=True)
    adj = adj / jnp.maximum(deg, 1.0)
    agg = adj @ x
    h = agg @ params["wl"] + params["bl"] + x @ params["wr"]
    h = jnp.maximum(h, 0.0)
    return h @ params["wfc"] + params["bfc"]


if __name__ == "__main__":
    # Small synthetic graph consistent with the module:
    #   num_features = 8, hidden_channels = 16, num_classes = 4, N = 16 nodes.
    N, F, H, C, E = 16, 8, 16, 4, 40

    key = jax.random.PRNGKey(0)
    kx, ke_src, ke_dst, k1, k2, k3, k4, k5 = jax.random.split(key, 8)

    x = jax.random.normal(kx, (N, F), dtype=jnp.float32)
    edge_index = jnp.stack(
        [
            jax.random.randint(ke_src, (E,), 0, N),
            jax.random.randint(ke_dst, (E,), 0, N),
        ],
        axis=0,
    ).astype(jnp.int32)

    # Deterministic parameter init (stand-in for SAGEConv + Linear weights).
    scale = 0.1
    params = {
        "wl": scale * jax.random.normal(k1, (F, H), dtype=jnp.float32),   # lin_l weight^T
        "bl": scale * jax.random.normal(k2, (1, H), dtype=jnp.float32),   # lin_l bias
        "wr": scale * jax.random.normal(k3, (F, H), dtype=jnp.float32),   # lin_r weight^T (no bias)
        "wfc": scale * jax.random.normal(k4, (H, C), dtype=jnp.float32),  # fc weight^T
        "bfc": scale * jax.random.normal(k5, (1, C), dtype=jnp.float32),  # fc bias
    }

    out = sage_mlc_forward(x, edge_index, params)
    out = jax.block_until_ready(out)

    ref = reference_forward(x, edge_index, params)
    assert out.shape == (N, C)
    # bf16 aggregation path -> tolerance loosened vs bit-exact f32 reference.
    assert jnp.allclose(out, ref, atol=2e-2, rtol=2e-2), "mismatch vs reference"

    print("KERNEL_OK")
</pallas_src>

<mosaic_0001>
module attributes {stable_mosaic.version = 11 : i64} {
  func.func @kernel(%arg0: i32, %arg1: i32, %arg2: memref<128x128xbf16, #tpu.memory_space<vmem>>, %arg3: memref<128x128xbf16, #tpu.memory_space<vmem>>, %arg4: memref<128x128xf32, #tpu.memory_space<vmem>>, %arg5: memref<128x1xf32, #tpu.memory_space<vmem>>, %arg6: memref<128x128xf32, #tpu.memory_space<vmem>>, %arg7: memref<1x128xf32, #tpu.memory_space<vmem>>, %arg8: memref<128x128xf32, #tpu.memory_space<vmem>>, %arg9: memref<128x128xf32, #tpu.memory_space<vmem>>, %arg10: memref<1x128xf32, #tpu.memory_space<vmem>>, %arg11: memref<128x128xf32, #tpu.memory_space<vmem>>, %arg12: memref<128x128xf32, #tpu.memory_space<vmem>>) attributes {dimension_semantics = [#tpu.dimension_semantics<parallel>, #tpu.dimension_semantics<arbitrary>], iteration_bounds = array<i64: 1, 1>, scalar_prefetch = 0 : i64, scratch_operands = 1 : i64, tpu.core_type = #tpu.core_type<tc>, window_params = [{transform_indices = @transform_0, window_bounds = array<i64: 128, 128>}, {pipeline_mode = #tpu.pipeline_mode<synchronous>, transform_indices = @transform_1, window_bounds = array<i64: 128, 128>}, {transform_indices = @transform_2, window_bounds = array<i64: 128, 128>}, {transform_indices = @transform_3, window_bounds = array<i64: 128, 1>}, {pipeline_mode = #tpu.pipeline_mode<synchronous>, transform_indices = @transform_4, window_bounds = array<i64: 128, 128>}, {pipeline_mode = #tpu.pipeline_mode<synchronous>, transform_indices = @transform_5, window_bounds = array<i64: 1, 128>}, {pipeline_mode = #tpu.pipeline_mode<synchronous>, transform_indices = @transform_6, window_bounds = array<i64: 128, 128>}, {pipeline_mode = #tpu.pipeline_mode<synchronous>, transform_indices = @transform_7, window_bounds = array<i64: 128, 128>}, {pipeline_mode = #tpu.pipeline_mode<synchronous>, transform_indices = @transform_8, window_bounds = array<i64: 1, 128>}, {transform_indices = @transform_9, window_bounds = array<i64: 128, 128>}]} {
    %c0_i32 = arith.constant 0 : i32
    %0 = arith.cmpi eq, %arg1, %c0_i32 : i32
    %1 = arith.extui %0 : i1 to i32
    %c0_i32_0 = arith.constant 0 : i32
    %2 = arith.cmpi ne, %1, %c0_i32_0 : i32
    scf.if %2 {
      %cst_9 = arith.constant 0.000000e+00 : f32
      %15 = vector.broadcast %cst_9 : f32 to vector<128x128xf32>
      %c0_10 = arith.constant 0 : index
      %c0_11 = arith.constant 0 : index
      %16 = vector.load %arg12[%c0_10, %c0_11] : memref<128x128xf32, #tpu.memory_space<vmem>>, vector<128x128xf32>
      tpu.vector_store %arg12[%c0_10, %c0_11], %15 {strides = array<i32>} : memref<128x128xf32, #tpu.memory_space<vmem>>, vector<128x128xf32>,
    } else {
    }
    %c128_i32 = arith.constant 128 : i32
    %3 = arith.muli %arg1, %c128_i32 : i32
    %4 = tpu.assume_multiple %3, 128 : i32
    %5 = arith.index_cast %4 : i32 to index
    %c0 = arith.constant 0 : index
    %6 = vector.load %arg3[%5, %c0] : memref<128x128xbf16, #tpu.memory_space<vmem>>, vector<128x128xbf16>
    %c0_1 = arith.constant 0 : index
    %c0_2 = arith.constant 0 : index
    %7 = vector.load %arg12[%c0_1, %c0_2] : memref<128x128xf32, #tpu.memory_space<vmem>>, vector<128x128xf32>
    %c0_3 = arith.constant 0 : index
    %c0_4 = arith.constant 0 : index
    %8 = vector.load %arg2[%c0_3, %c0_4] : memref<128x128xbf16, #tpu.memory_space<vmem>>, vector<128x128xbf16>
    %cst = arith.constant dense<0.000000e+00> : vector<128x128xf32>
    %9 = tpu.matmul %8, %6, %cst {dimension_numbers = #tpu.dot_dimension_numbers<[1], [0], [0], [1], [0, 0, 1, 1], [], []>} : vector<128x128xbf16>, vector<128x128xbf16>, vector<128x128xf32> -> vector<128x128xf32>
    %10 = arith.addf %7, %9 : vector<128x128xf32>
    %c0_5 = arith.constant 0 : index
    %c0_6 = arith.constant 0 : index
    %11 = vector.load %arg12[%c0_5, %c0_6] : memref<128x128xf32, #tpu.memory_space<vmem>>, vector<128x128xf32>
    tpu.vector_store %arg12[%c0_5, %c0_6], %10 {strides = array<i32>} : memref<128x128xf32, #tpu.memory_space<vmem>>, vector<128x128xf32>,
    %c0_i32_7 = arith.constant 0 : i32
    %12 = arith.cmpi eq, %arg1, %c0_i32_7 : i32
    %13 = arith.extui %12 : i1 to i32
    %c0_i32_8 = arith.constant 0 : i32
    %14 = arith.cmpi ne, %13, %c0_i32_8 : i32
    scf.if %14 {
      %c0_9 = arith.constant 0 : index
      %c0_10 = arith.constant 0 : index
      %15 = vector.load %arg12[%c0_9, %c0_10] : memref<128x128xf32, #tpu.memory_space<vmem>>, vector<128x128xf32>
      %c0_11 = arith.constant 0 : index
      %c0_12 = arith.constant 0 : index
      %16 = vector.load %arg5[%c0_11, %c0_12] : memref<128x1xf32, #tpu.memory_space<vmem>>, vector<128x1xf32>
      %17 = vector.broadcast %16 : vector<128x1xf32> to vector<128x128xf32>
      %18 = arith.mulf %15, %17 : vector<128x128xf32>
      %c0_13 = arith.constant 0 : index
      %c0_14 = arith.constant 0 : index
      %19 = vector.load %arg6[%c0_13, %c0_14] : memref<128x128xf32, #tpu.memory_space<vmem>>, vector<128x128xf32>
      %cst_15 = arith.constant dense<0.000000e+00> : vector<128x128xf32>
      %20 = tpu.matmul %18, %19, %cst_15 {dimension_numbers = #tpu.dot_dimension_numbers<[1], [0], [0], [1], [0, 0, 1, 1], [], []>} : vector<128x128xf32>, vector<128x128xf32>, vector<128x128xf32> -> vector<128x128xf32>
      %c0_16 = arith.constant 0 : index
      %c0_17 = arith.constant 0 : index
      %21 = vector.load %arg7[%c0_16, %c0_17] : memref<1x128xf32, #tpu.memory_space<vmem>>, vector<1x128xf32>
      %22 = vector.broadcast %21 : vector<1x128xf32> to vector<128x128xf32>
      %23 = arith.addf %20, %22 : vector<128x128xf32>
      %c0_18 = arith.constant 0 : index
      %c0_19 = arith.constant 0 : index
      %24 = vector.load %arg4[%c0_18, %c0_19] : memref<128x128xf32, #tpu.memory_space<vmem>>, vector<128x128xf32>
      %c0_20 = arith.constant 0 : index
      %c0_21 = arith.constant 0 : index
      %25 = vector.load %arg8[%c0_20, %c0_21] : memref<128x128xf32, #tpu.memory_space<vmem>>, vector<128x128xf32>
      %cst_22 = arith.constant dense<0.000000e+00> : vector<128x128xf32>
      %26 = tpu.matmul %24, %25, %cst_22 {dimension_numbers = #tpu.dot_dimension_numbers<[1], [0], [0], [1], [0, 0, 1, 1], [], []>} : vector<128x128xf32>, vector<128x128xf32>, vector<128x128xf32> -> vector<128x128xf32>
      %27 = arith.addf %23, %26 : vector<128x128xf32>
      %cst_23 = arith.constant 0.000000e+00 : f32
      %28 = vector.broadcast %cst_23 : f32 to vector<128x128xf32>
      %29 = arith.maximumf %27, %28 : vector<128x128xf32>
      %c0_24 = arith.constant 0 : index
      %c0_25 = arith.constant 0 : index
      %30 = vector.load %arg9[%c0_24, %c0_25] : memref<128x128xf32, #tpu.memory_space<vmem>>, vector<128x128xf32>
      %cst_26 = arith.constant dense<0.000000e+00> : vector<128x128xf32>
      %31 = tpu.matmul %29, %30, %cst_26 {dimension_numbers = #tpu.dot_dimension_numbers<[1], [0], [0], [1], [0, 0, 1, 1], [], []>} : vector<128x128xf32>, vector<128x128xf32>, vector<128x128xf32> -> vector<128x128xf32>
      %c0_27 = arith.constant 0 : index
      %c0_28 = arith.constant 0 : index
      %32 = vector.load %arg10[%c0_27, %c0_28] : memref<1x128xf32, #tpu.memory_space<vmem>>, vector<1x128xf32>
      %33 = vector.broadcast %32 : vector<1x128xf32> to vector<128x128xf32>
      %34 = arith.addf %31, %33 : vector<128x128xf32>
      %c0_29 = arith.constant 0 : index
      %c0_30 = arith.constant 0 : index
      %35 = vector.load %arg11[%c0_29, %c0_30] : memref<128x128xf32, #tpu.memory_space<vmem>>, vector<128x128xf32>
      tpu.vector_store %arg11[%c0_29, %c0_30], %34 {strides = array<i32>} : memref<128x128xf32, #tpu.memory_space<vmem>>, vector<128x128xf32>,
    } else {
    }
    return
  }
  func.func @transform_0(%arg0: i32, %arg1: i32) -> (i32, i32) {
    %c0_i32 = arith.constant 0 : i32
    return %arg0, %arg1 : i32, i32
  }
  func.func @transform_1(%arg0: i32, %arg1: i32) -> (i32, i32) {
    %c0_i32 = arith.constant 0 : i32
    %c0_i32_0 = arith.constant 0 : i32
    %c0_i32_1 = arith.constant 0 : i32
    return %c0_i32, %c0_i32_0 : i32, i32
  }
  func.func @transform_2(%arg0: i32, %arg1: i32) -> (i32, i32) {
    %c0_i32 = arith.constant 0 : i32
    %c0_i32_0 = arith.constant 0 : i32
    return %arg0, %c0_i32 : i32, i32
  }
  func.func @transform_3(%arg0: i32, %arg1: i32) -> (i32, i32) {
    %c0_i32 = arith.constant 0 : i32
    %c0_i32_0 = arith.constant 0 : i32
    return %arg0, %c0_i32 : i32, i32
  }
  func.func @transform_4(%arg0: i32, %arg1: i32) -> (i32, i32) {
    %c0_i32 = arith.constant 0 : i32
    %c0_i32_0 = arith.constant 0 : i32
    %c0_i32_1 = arith.constant 0 : i32
    return %c0_i32, %c0_i32_0 : i32, i32
  }
  func.func @transform_5(%arg0: i32, %arg1: i32) -> (i32, i32) {
    %c0_i32 = arith.constant 0 : i32
    %c0_i32_0 = arith.constant 0 : i32
    %c0_i32_1 = arith.constant 0 : i32
    return %c0_i32, %c0_i32_0 : i32, i32
  }
  func.func @transform_6(%arg0: i32, %arg1: i32) -> (i32, i32) {
    %c0_i32 = arith.constant 0 : i32
    %c0_i32_0 = arith.constant 0 : i32
    %c0_i32_1 = arith.constant 0 : i32
    return %c0_i32, %c0_i32_0 : i32, i32
  }
  func.func @transform_7(%arg0: i32, %arg1: i32) -> (i32, i32) {
    %c0_i32 = arith.constant 0 : i32
    %c0_i32_0 = arith.constant 0 : i32
    %c0_i32_1 = arith.constant 0 : i32
    return %c0_i32, %c0_i32_0 : i32, i32
  }
  func.func @transform_8(%arg0: i32, %arg1: i32) -> (i32, i32) {
    %c0_i32 = arith.constant 0 : i32
    %c0_i32_0 = arith.constant 0 : i32
    %c0_i32_1 = arith.constant 0 : i32
    return %c0_i32, %c0_i32_0 : i32, i32
  }
  func.func @transform_9(%arg0: i32, %arg1: i32) -> (i32, i32) {
    %c0_i32 = arith.constant 0 : i32
    %c0_i32_0 = arith.constant 0 : i32
    return %arg0, %c0_i32 : i32, i32
  }
}

</mosaic_0001>

<bundles_post_ra>
// kernel: tpu_custom_call.1
= control target key start
LH: loop header
LB: loop body
LE: loop exit
PB: predicated region body
PF: predicated region fallthrough
CT: control target
= control target key end

     0   :  { %14 = vsyncpa [#allocation4], 0  ;;  %s1993_s0 = inlined_call_operand.hbm [shape: bf16[128,128], index: 0, kind: input, shape index: {}]   ;;  %s1994_s1 = inlined_call_operand.hbm [shape: bf16[128,128], index: 1, kind: input, shape index: {}]   ;;  %s1995_s2 = inlined_call_operand.vmem [shape: f32[128,128], index: 2, kind: input, shape index: {}]   ;;  %s1996_s3 = inlined_call_operand.vmem [shape: f32[128,1], index: 3, kind: input, shape index: {}]   ;;  %s1997_s4 = inlined_call_operand.hbm [shape: f32[128,128], index: 4, kind: input, shape index: {}]   ;;  %s1998_s5 = inlined_call_operand.vmem [shape: f32[1,128], index: 5, kind: input, shape index: {}]   ;;  %s1999_s6 = inlined_call_operand.hbm [shape: f32[128,128], index: 6, kind: input, shape index: {}]   ;;  %s2000_s7 = inlined_call_operand.hbm [shape: f32[128,128], index: 7, kind: input, shape index: {}]   ;;  %s2001_s8 = inlined_call_operand.vmem [shape: f32[1,128], index: 8, kind: input, shape index: {}]   ;;  %s2002_s9 = inlined_call_operand.hbm [shape: f32[128,128], index: 9, kind: output, shape index: {}]  }
   0x1   :  { %15 = vsyncpa [#allocation7], 0 }
   0x2   :  { %16 = vsyncpa [#allocation10], 0 }
   0x3   :  { %17 = vsyncpa [#allocation5], 0  ;;  %s1740_s30 = smov [#allocation6]   ;;  %s1600_s13 = scalar_lea.hbm %s1994_s1, 1024 }
   0x4   :  { %s35_s10 = sshll.u32 %s1740_s30, 4  ;;  %p1601_p0 = scmp.ne.s32.totalorder %s1994_s1, %s1600_s13  ;;  %s36_s10 = int_to_ptr.vmem [resolvable:$true] %s35_s10 }
   0x5   :  { %p1604_p1 = scmp.lt.u32.totalorder %s1600_s13, %s1994_s1 }
   0x7   :  { %p1606_p2 = pnand %p1604_p1, %p1601_p0 }
   0x9   :  { %1609 = shalt.err (!%p1606_p2)
}
   0xa   :  { %s1610_s18 = scalar_lea.vmem %s36_s10, 1024  ;;  %p1615_p4 = scmp.lt.s32.totalorder %s36_s10, %s36_s10 }
   0xb   :  { %p1611_p3 = scmp.ne.s32.totalorder %s36_s10, %s1610_s18  ;;  %p1616_p5 = scmp.lt.s32.totalorder %s1610_s18, %s1610_s18 }
   0xd   :  { %p1617_p6 = por %p1616_p5, %p1615_p4 }
   0xf   :  { %p1618_p7 = pnand %p1617_p6, %p1611_p3 }
  0x11   :  { %1621 = shalt.err (!%p1618_p7)
}
  0x12   :  { %s1741_s19 = smov 64   ;;  %s1742_s20 = smov 4  }
  0x13   :  { %41 = dma.hbm_to_vmem [thread:$0]  %s1994_s1, 1024, %s36_s10, [#allocation7], %s1741_s19, %s1741_s19, %s1742_s20  }
  0x14   :  { %s1743_s23 = smov [#allocation9]   ;;  %s1744_s25 = smov [#allocation3]  }
  0x15   :  { %s65_s24 = sshll.u32 %s1743_s23, 4  ;;  %s23_s26 = sshll.u32 %s1744_s25, 4  ;;  %s66_s24 = int_to_ptr.vmem [resolvable:$true] %s65_s24  ;;  %s24_s26 = int_to_ptr.vmem [resolvable:$true] %s23_s26 }
  0x16   :  { %s1622_s29 = scalar_lea.hbm %s1999_s6, 2048 }
  0x17   :  { %p1623_p8 = scmp.ne.s32.totalorder %s1999_s6, %s1622_s29  ;;  %p1626_p9 = scmp.lt.u32.totalorder %s1622_s29, %s1999_s6 }
  0x19   :  { %p1628_p10 = pnand %p1626_p9, %p1623_p8 }
  0x1b   :  { %1631 = shalt.err (!%p1628_p10)
}
  0x1c   :  { %s1632_s1 = scalar_lea.vmem %s66_s24, 2048  ;;  %p1637_p12 = scmp.lt.s32.totalorder %s66_s24, %s66_s24 }
  0x1d   :  { %p1633_p11 = scmp.ne.s32.totalorder %s66_s24, %s1632_s1  ;;  %p1638_p13 = scmp.lt.s32.totalorder %s1632_s1, %s1632_s1 }
  0x1f   :  { %p1639_p0 = por %p1638_p13, %p1637_p12 }
  0x21   :  { %p1640_p1 = pnand %p1639_p0, %p1633_p11 }
  0x23   :  { %1643 = shalt.err (!%p1640_p1)
}
  0x24   :  { %s1745_s10 = smov 128   ;;  %s1746_s14 = smov 8  }
  0x25   :  { %71 = dma.hbm_to_vmem [thread:$0]  %s1999_s6, 2048, %s66_s24, [#allocation10], %s1745_s10, %s1745_s10, %s1746_s14  }
  0x26   :  { %s1644_s21 = scalar_lea.hbm %s1993_s0, 1024 }
  0x27   :  { %p1645_p2 = scmp.ne.s32.totalorder %s1993_s0, %s1644_s21  ;;  %p1648_p3 = scmp.lt.u32.totalorder %s1644_s21, %s1993_s0 }
  0x29   :  { %p1650_p4 = pnand %p1648_p3, %p1645_p2 }
  0x2b   :  { %1653 = shalt.err (!%p1650_p4)
}
  0x2c   :  { %s1654_s28 = scalar_lea.vmem %s24_s26, 1024  ;;  %p1659_p6 = scmp.lt.s32.totalorder %s24_s26, %s24_s26 }
  0x2d   :  { %p1655_p5 = scmp.ne.s32.totalorder %s24_s26, %s1654_s28  ;;  %p1660_p7 = scmp.lt.s32.totalorder %s1654_s28, %s1654_s28 }
  0x2f   :  { %p1661_p8 = por %p1660_p7, %p1659_p6 }
  0x31   :  { %p1662_p9 = pnand %p1661_p8, %p1655_p5 }
  0x33   :  { %1665 = shalt.err (!%p1662_p9)
}
  0x34   :  { %29 = dma.hbm_to_vmem [thread:$0]  %s1993_s0, 1024, %s24_s26, [#allocation4], %s1741_s19, %s1741_s19, %s1742_s20  }
  0x35   :  { %s1747_s29 = smov [#allocation8]   ;;  %s1748_s11 = smov [#allocation11]  }
  0x36   :  { %s51_s30 = sshll.u32 %s1747_s29, 4  ;;  %s77_s12 = sshll.u32 %s1748_s11, 4  ;;  %s52_s30 = int_to_ptr.vmem [resolvable:$true] %s51_s30  ;;  %s78_s12 = int_to_ptr.vmem [resolvable:$true] %s77_s12 }
  0x37   :  { %s1666_s15 = scalar_lea.hbm %s1997_s4, 2048 }
  0x38   :  { %p1667_p10 = scmp.ne.s32.totalorder %s1997_s4, %s1666_s15  ;;  %p1670_p11 = scmp.lt.u32.totalorder %s1666_s15, %s1997_s4 }
  0x3a   :  { %p1672_p12 = pnand %p1670_p11, %p1667_p10 }
  0x3c   :  { %1675 = shalt.err (!%p1672_p12)
}
  0x3d   :  { %s1676_s0 = scalar_lea.vmem %s52_s30, 2048  ;;  %p1681_p0 = scmp.lt.s32.totalorder %s52_s30, %s52_s30 }
  0x3e   :  { %p1677_p13 = scmp.ne.s32.totalorder %s52_s30, %s1676_s0  ;;  %p1682_p1 = scmp.lt.s32.totalorder %s1676_s0, %s1676_s0 }
  0x40   :  { %p1683_p2 = por %p1682_p1, %p1681_p0 }
  0x42   :  { %p1684_p3 = pnand %p1683_p2, %p1677_p13 }
  0x44   :  { %1687 = shalt.err (!%p1684_p3)
}
  0x45   :  { %57 = dma.hbm_to_vmem [thread:$0]  %s1997_s4, 2048, %s52_s30, [#allocation7], %s1745_s10, %s1745_s10, %s1746_s14  }
  0x46   :  { %s1688_s23 = scalar_lea.hbm %s2000_s7, 2048 }
  0x47   :  { %p1689_p4 = scmp.ne.s32.totalorder %s2000_s7, %s1688_s23  ;;  %p1692_p5 = scmp.lt.u32.totalorder %s1688_s23, %s2000_s7 }
  0x49   :  { %p1694_p6 = pnand %p1692_p5, %p1689_p4 }
  0x4b   :  { %1697 = shalt.err (!%p1694_p6)
}
  0x4c   :  { %s1698_s24 = scalar_lea.vmem %s78_s12, 2048  ;;  %p1703_p8 = scmp.lt.s32.totalorder %s78_s12, %s78_s12 }
  0x4d   :  { %p1699_p7 = scmp.ne.s32.totalorder %s78_s12, %s1698_s24  ;;  %p1704_p9 = scmp.lt.s32.totalorder %s1698_s24, %s1698_s24 }
  0x4f   :  { %p1705_p10 = por %p1704_p9, %p1703_p8 }
  0x51   :  { %p1706_p11 = pnand %p1705_p10, %p1699_p7 }
  0x53   :  { %1709 = shalt.err (!%p1706_p11)
}
  0x54   :  { %83 = dma.hbm_to_vmem [thread:$0]  %s2000_s7, 2048, %s78_s12, [#allocation10], %s1745_s10, %s1745_s10, %s1746_s14  }
  0x55   :  { %1732 = dma.done.wait [#allocation4], 1024  }
  0x56   :  { %1733 = vsyncadd [#allocation4], 4294966272 }
  0x57   :  { %1734 = dma.done.wait [#allocation7], 3072  }
  0x58   :  { %1735 = vsyncadd [#allocation7], 4294964224 }
  0x59   :  { %1736 = dma.done.wait [#allocation10], 4096  }
  0x5a   :  { %1737 = vsyncadd [#allocation10], 4294963200  ;;  %v1749_v0 = vmov 0   ;;  %v1584_v1 = vld [vmem:[#allocation6] sm:$0xff]   ;;  %v1585_v2 = vld [vmem:[#allocation6 + $0x8] sm:$0xff]  }
  0x5b   :  { %1582 = vset.pattern.permute.xlu0 %v1749_v0  ;;  %1583 = vset.pattern.permute.xlu1 %v1749_v0  ;;  %v1586_v3 = vld [vmem:[#allocation6 + $0x10] sm:$0xff]   ;;  %v1587_v4 = vld [vmem:[#allocation6 + $0x18] sm:$0xff]   ;;  %v1592_v5 = vld [vmem:[#allocation3] sm:$0xff]  }
  0x5c   :  { %1243 = vmatprep.subr.bf16.mxu0 %v1584_v1  ;;  %1259 = vmatprep.mubr.bf16.mxu0 %v1592_v5  ;;  %v1588_v6 = vld [vmem:[#allocation6 + $0x20] sm:$0xff]   ;;  %v1589_v7 = vld [vmem:[#allocation6 + $0x28] sm:$0xff]   ;;  %v421_v9 = vld [vmem:[%s1996_s3 + $0x10] sm:$0xff] }
  0x5d   :  { %1244 = vmatpush3.bf16.msra.mxu0 %v1584_v1  ;;  %v419_v8 = vld [vmem:[%s1996_s3] sm:$0xff]  ;;  %447 = vperm.xlu1 %1583, %v421_v9   ;;  %v420_v10 = vld [vmem:[%s1996_s3 + $0x8] sm:$0xff]  ;;  %v422_v11 = vld [vmem:[%s1996_s3 + $0x18] sm:$0xff] }
  0x5e   :  { %1245 = vmatprep.subr.bf16.mxu0 %v1585_v2  ;;  %437 = vperm.xlu0 %1582, %v419_v8   ;;  %v1590_v12 = vld [vmem:[#allocation6 + $0x30] sm:$0xff]   ;;  %v423_v13 = vld [vmem:[%s1996_s3 + $0x20] sm:$0xff]  ;;  %v532_v15 = vld [vmem:[#allocation8 + $0x8] sm:$0xff] }
  0x5f   :  { %v531_v14 = vld [vmem:[#allocation8] sm:$0xff]  ;;  %v424_v16 = vld [vmem:[%s1996_s3 + $0x28] sm:$0xff]  ;;  %v533_v18 = vld [vmem:[#allocation8 + $0x10] sm:$0xff] }
  0x60   :  { %v1443_v17 = vpack.c.bf16 %v532_v15, %v531_v14  ;;  %v534_v19 = vld [vmem:[#allocation8 + $0x18] sm:$0xff]  ;;  %v535_v22 = vld [vmem:[#allocation8 + $0x20] sm:$0xff]  ;;  %v536_v23 = vld [vmem:[#allocation8 + $0x28] sm:$0xff] }
  0x61   :  { %1246 = vmatpush3.bf16.msra.mxu0 %v1585_v2  ;;  %452 = vperm.xlu1 %1583, %v422_v11   ;;  %v1447_v20 = vpack.c.bf16 %v534_v19, %v533_v18  ;;  %v1591_v21 = vld [vmem:[#allocation6 + $0x38] sm:$0xff]   ;;  %v425_v24 = vld [vmem:[%s1996_s3 + $0x30] sm:$0xff]  ;;  %v1451_v26 = vpack.c.bf16 %v536_v23, %v535_v22  ;;  %v1593_v29 = vld [vmem:[#allocation3 + $0x8] sm:$0xff]  }
  0x62   :  { %1247 = vmatprep.subr.bf16.mxu0 %v1586_v3  ;;  %442 = vperm.xlu0 %1582, %v420_v10   ;;  %v426_v25 = vld [vmem:[%s1996_s3 + $0x38] sm:$0xff]  ;;  %v537_v27 = vld [vmem:[#allocation8 + $0x30] sm:$0xff]  ;;  %v427_v30 = vld [vmem:[%s1996_s3 + $0x40] sm:$0xff] }
  0x63   :  { %1444 = vmatprep.subr.bf16.mxu1 %v1443_v17  ;;  %v538_v28 = vld [vmem:[#allocation8 + $0x38] sm:$0xff]  ;;  %v428_v31 = vld [vmem:[%s1996_s3 + $0x48] sm:$0xff]  ;;  %v1594_v32 = vld [vmem:[#allocation3 + $0x10] sm:$0xff]  }
  0x64   :  { %1446 = vmatpush3.bf16.msra.mxu1 %v1443_v17  ;;  %v1455_v33 = vpack.c.bf16 %v538_v28, %v537_v27  ;;  %v539_v34 = vld [vmem:[#allocation8 + $0x40] sm:$0xff]  ;;  %v540_v35 = vld [vmem:[#allocation8 + $0x48] sm:$0xff]  ;;  %v429_v36 = vld [vmem:[%s1996_s3 + $0x50] sm:$0xff] }
  0x65   :  { %1248 = vmatpush3.bf16.msra.mxu0 %v1586_v3  ;;  %462 = vperm.xlu1 %1583, %v424_v16   ;;  %v430_v37 = vld [vmem:[%s1996_s3 + $0x58] sm:$0xff]  ;;  %v1459_v38 = vpack.c.bf16 %v540_v35, %v539_v34  ;;  %v541_v39 = vld [vmem:[#allocation8 + $0x50] sm:$0xff]  ;;  %v431_v42 = vld [vmem:[%s1996_s3 + $0x60] sm:$0xff] }
  0x66   :  { %1249 = vmatprep.subr.bf16.mxu0 %v1587_v4  ;;  %457 = vperm.xlu0 %1582, %v423_v13   ;;  %v542_v40 = vld [vmem:[#allocation8 + $0x58] sm:$0xff]  ;;  %v432_v43 = vld [vmem:[%s1996_s3 + $0x68] sm:$0xff]  ;;  %v1596_v44 = vld [vmem:[#allocation3 + $0x20] sm:$0xff]  }
  0x67   :  { %1448 = vmatprep.subr.bf16.mxu1 %v1447_v20  ;;  %v1595_v41 = vld [vmem:[#allocation3 + $0x18] sm:$0xff]   ;;  %v1463_v45 = vpack.c.bf16 %v542_v40, %v541_v39  ;;  %v543_v46 = vld [vmem:[#allocation8 + $0x60] sm:$0xff]  ;;  %v544_v47 = vld [vmem:[#allocation8 + $0x68] sm:$0xff] }
  0x68   :  { %1450 = vmatpush3.bf16.msra.mxu1 %v1447_v20  ;;  %v433_v48 = vld [vmem:[%s1996_s3 + $0x70] sm:$0xff]  ;;  %v434_v49 = vld [vmem:[%s1996_s3 + $0x78] sm:$0xff]  ;;  %v1467_v50 = vpack.c.bf16 %v544_v47, %v543_v46  ;;  %v1597_v51 = vld [vmem:[#allocation3 + $0x28] sm:$0xff]  }
  0x69   :  { %1250 = vmatpush3.bf16.msra.mxu0 %v1587_v4  ;;  %472 = vperm.xlu1 %1583, %v426_v25   ;;  %v1598_v52 = vld [vmem:[#allocation3 + $0x30] sm:$0xff]   ;;  %v1599_v53 = vld [vmem:[#allocation3 + $0x38] sm:$0xff]   ;;  %v715_v57 = vld [vmem:[#allocation9] sm:$0xff] }
  0x6a   :  { %1251 = vmatprep.subr.bf16.mxu0 %v1588_v6  ;;  %467 = vperm.xlu0 %1582, %v425_v24   ;;  %v545_v54 = vld [vmem:[#allocation8 + $0x70] sm:$0xff]  ;;  %v546_v55 = vld [vmem:[#allocation8 + $0x78] sm:$0xff]  ;;  %v716_v58 = vld [vmem:[#allocation9 + $0x8] sm:$0xff] }
  0x6b   :  { %1452 = vmatprep.subr.bf16.mxu1 %v1451_v26  ;;  %v1471_v56 = vpack.c.bf16 %v546_v55, %v545_v54  ;;  %v1475_v59 = vpack.c.bf16 %v716_v58, %v715_v57  ;;  %v908_v60 = vld [vmem:[#allocation11] sm:$0xff]  ;;  %v909_v61 = vld [vmem:[#allocation11 + $0x8] sm:$0xff]  ;;  %v910_v62 = vld [vmem:[#allocation11 + $0x10] sm:$0xff] }
  0x6c   :  { %1454 = vmatpush3.bf16.msra.mxu1 %v1451_v26  ;;  %v1507_v63 = vpack.c.bf16 %v909_v61, %v908_v60  ;;  %v911_v0 = vld [vmem:[#allocation11 + $0x18] sm:$0xff]  ;;  %v912_v2 = vld [vmem:[#allocation11 + $0x20] sm:$0xff]  ;;  %v913_v3 = vld [vmem:[#allocation11 + $0x28] sm:$0xff] }
  0x6d   :  { %1252 = vmatpush3.bf16.msra.mxu0 %v1588_v6  ;;  %482 = vperm.xlu1 %1583, %v428_v31   ;;  %v1511_v1 = vpack.c.bf16 %v911_v0, %v910_v62  ;;  %v1515_v4 = vpack.c.bf16 %v913_v3, %v912_v2  ;;  %v914_v5 = vld [vmem:[#allocation11 + $0x30] sm:$0xff]  ;;  %v915_v6 = vld [vmem:[#allocation11 + $0x38] sm:$0xff]  ;;  %v916_v8 = vld [vmem:[#allocation11 + $0x40] sm:$0xff] }
  0x6e   :  { %1253 = vmatprep.subr.bf16.mxu0 %v1589_v7  ;;  %477 = vperm.xlu0 %1582, %v427_v30   ;;  %v917_v9 = vld [vmem:[#allocation11 + $0x48] sm:$0xff]  ;;  %v918_v11 = vld [vmem:[#allocation11 + $0x50] sm:$0xff]  ;;  %v920_v14 = vld [vmem:[#allocation11 + $0x60] sm:$0xff] }
  0x6f   :  { %1456 = vmatprep.subr.bf16.mxu1 %v1455_v33  ;;  %v1523_v10 = vpack.c.bf16 %v917_v9, %v916_v8  ;;  %v921_v15 = vld [vmem:[#allocation11 + $0x68] sm:$0xff]  ;;  %v717_v25 = vld [vmem:[#allocation9 + $0x10] sm:$0xff]  ;;  %v718_v26 = vld [vmem:[#allocation9 + $0x18] sm:$0xff] }
  0x70   :  { %1458 = vmatpush3.bf16.msra.mxu1 %v1455_v33  ;;  %v1531_v16 = vpack.c.bf16 %v921_v15, %v920_v14  ;;  %v719_v34 = vld [vmem:[#allocation9 + $0x20] sm:$0xff]  ;;  %v720_v35 = vld [vmem:[#allocation9 + $0x28] sm:$0xff]  ;;  %v725_v58 = vld [vmem:[#allocation9 + $0x50] sm:$0xff] }
  0x71   :  { %1254 = vmatpush3.bf16.msra.mxu0 %v1589_v7  ;;  %492 = vperm.xlu1 %1583, %v430_v37   ;;  %v1519_v7 = vpack.c.bf16 %v915_v6, %v914_v5  ;;  %v1483_v39 = vpack.c.bf16 %v720_v35, %v719_v34  ;;  %v727_v3 = vld [vmem:[#allocation9 + $0x60] sm:$0xff]  ;;  %v712_v35 = vld [vmem:[%s1995_s2 + $0x68] sm:$0xff] }
  0x72   :  { %1255 = vmatprep.subr.bf16.mxu0 %v1590_v12  ;;  %487 = vperm.xlu0 %1582, %v429_v36   ;;  %v711_v34 = vld [vmem:[%s1995_s2 + $0x60] sm:$0xff] }
  0x73   :  { %1460 = vmatprep.subr.bf16.mxu1 %v1459_v38 }
  0x74   :  { %1462 = vmatpush3.bf16.msra.mxu1 %v1459_v38 }
  0x75   :  { %1256 = vmatpush3.bf16.msra.mxu0 %v1590_v12  ;;  %502 = vperm.xlu1 %1583, %v432_v43   ;;  %v919_v12 = vld [vmem:[#allocation11 + $0x58] sm:$0xff] }
  0x76   :  { %1257 = vmatprep.subr.bf16.mxu0 %v1591_v21  ;;  %497 = vperm.xlu0 %1582, %v431_v42   ;;  %v1527_v13 = vpack.c.bf16 %v919_v12, %v918_v11  ;;  %v722_v42 = vld [vmem:[#allocation9 + $0x38] sm:$0xff]  ;;  %v729_v11 = vld [vmem:[#allocation9 + $0x70] sm:$0xff] }
  0x77   :  { %1464 = vmatprep.subr.bf16.mxu1 %v1463_v45  ;;  %v730_v12 = vld [vmem:[#allocation9 + $0x78] sm:$0xff] }
  0x78   :  { %1466 = vmatpush3.bf16.msra.mxu1 %v1463_v45 }
  0x79   :  { %1258 = vmatpush3.bf16.msra.mxu0 %v1591_v21  ;;  %512 = vperm.xlu1 %1583, %v434_v49  }
  0x7a   :  { %507 = vperm.xlu0 %1582, %v433_v48   ;;  %1468 = vmatprep.subr.bf16.mxu1 %v1467_v50 }
  0x7b   :  { %1508 = vmatprep.subr.bf16.mxu0 %v1507_v63 }
  0x7c   :  { %1260 = vmatmul.mubr.bf16.vlgmr.msra.gmra.mrb[0].mxu0 %v1593_v29  ;;  %1470 = vmatpush3.bf16.msra.mxu1 %v1467_v50 }
  0x7d   :  { %1263 = vmatprep.mubr.bf16.mxu0 %v1594_v32  ;;  %1472 = vmatprep.subr.bf16.mxu1 %v1471_v56  ;;  %v1479_v32 = vpack.c.bf16 %v718_v26, %v717_v25  ;;  %v702_v25 = vld [vmem:[%s1995_s2 + $0x18] sm:$0xff]  ;;  %v703_v26 = vld [vmem:[%s1995_s2 + $0x20] sm:$0xff] }
  0x7e   :  { %1510 = vmatpush3.bf16.msra.mxu0 %v1507_v63 }
  0x7f   :  { %1512 = vmatprep.subr.bf16.mxu0 %v1511_v1 }
  0x80   :  { %1474 = vmatpush3.bf16.msra.mxu1 %v1471_v56 }
  0x81   :  { %1476 = vmatprep.subr.bf16.mxu1 %v1475_v59 }
  0x82   :  { %1514 = vmatpush3.bf16.msra.mxu0 %v1511_v1 }
  0x83   :  { %1516 = vmatprep.subr.bf16.mxu0 %v1515_v4 }
  0x84   :  { %1264 = vmatmul.mubr.bf16.gmra.mrb[4].mxu0 %v1595_v41  ;;  %v721_v41 = vld [vmem:[#allocation9 + $0x30] sm:$0xff] }
  0x85   :  { %1267 = vmatprep.mubr.bf16.mxu0 %v1596_v44  ;;  %v1487_v48 = vpack.c.bf16 %v722_v42, %v721_v41  ;;  %v1129_v41 = vld [vmem:[%s1998_s5] ss:$0 sm:$0xff] }
  0x86   :  { %1518 = vmatpush3.bf16.msra.mxu0 %v1515_v4  ;;  %v728_v4 = vld [vmem:[#allocation9 + $0x68] sm:$0xff] }
  0x87   :  { %1520 = vmatprep.subr.bf16.mxu0 %v1519_v7  ;;  %v1499_v8 = vpack.c.bf16 %v728_v4, %v727_v3 }
  0x8a   :  { %1522 = vmatpush3.bf16.msra.mxu0 %v1519_v7 }
  0x8b   :  { %1524 = vmatprep.subr.bf16.mxu0 %v1523_v10 }
  0x8c   :  { %1268 = vmatmul.mubr.bf16.gmra.mrb[8].mxu0 %v1597_v51  ;;  %v723_v51 = vld [vmem:[#allocation9 + $0x40] sm:$0xff] }
  0x8d   :  { %1271 = vmatprep.mubr.bf16.mxu0 %v1598_v52  ;;  %v724_v52 = vld [vmem:[#allocation9 + $0x48] sm:$0xff] }
  0x8e   :  { %1526 = vmatpush3.bf16.msra.mxu0 %v1523_v10  ;;  %v1491_v56 = vpack.c.bf16 %v724_v52, %v723_v51 }
  0x8f   :  { %1528 = vmatprep.subr.bf16.mxu0 %v1527_v13 }
  0x92   :  { %1530 = vmatpush3.bf16.msra.mxu0 %v1527_v13 }
  0x93   :  { %1532 = vmatprep.subr.bf16.mxu0 %v1531_v16 }
  0x94   :  { %1272 = vmatmul.mubr.bf16.gmra.mrb[12].mxu0 %v1599_v53 }
  0x96   :  { %1534 = vmatpush3.bf16.msra.mxu0 %v1531_v16 }
  0xdc   :  { %v448_v18 = vpop.permute.xlu1 %447 }
  0xdd   :  { %v438_v17 = vpop.permute.xlu0 %437 }
  0xe0   :  { %v453_v20 = vpop.permute.xlu1 %452 }
  0xe1   :  { %v443_v19 = vpop.permute.xlu0 %442 }
  0xe4   :  { %v463_v23 = vpop.permute.xlu1 %462 }
  0xe5   :  { %v458_v21 = vpop.permute.xlu0 %457 }
  0xe8   :  { %v473_v36 = vpop.permute.xlu1 %472 }
  0xe9   :  { %v468_v30 = vpop.permute.xlu0 %467 }
  0xec   :  { %v483_v49 = vpop.permute.xlu1 %482 }
  0xed   :  { %v478_v43 = vpop.permute.xlu0 %477 }
  0xf0   :  { %v493_v62 = vpop.permute.xlu1 %492 }
  0xf1   :  { %v488_v53 = vpop.permute.xlu0 %487 }
  0xf4   :  { %v503_v9 = vpop.permute.xlu1 %502 }
  0xf5   :  { %v498_v5 = vpop.permute.xlu0 %497 }
  0xf9   :  { %v508_v16 = vpop.permute.xlu0 %507 }
 0x14f   :  { %v1261_v22 = vpop.f32.mrb[0].mxu0 }
 0x150   :  { %v305_v24 = vpop.f32.mrb[1].mxu0  ;;  %v517_v33 = vmul.f32 %v1261_v22, %v448_v18  ;;  %v1503_v18 = vpack.c.bf16 %v730_v12, %v729_v11  ;;  %v699_v22 = vld [vmem:[%s1995_s2] sm:$0xff] }
 0x151   :  { %v1262_v27 = vpop.f32.mrb[2].mxu0  ;;  %v515_v28 = vmul.f32 %v438_v17, %v305_v24  ;;  %v701_v24 = vld [vmem:[%s1995_s2 + $0x10] sm:$0xff] }
 0x152   :  { %v308_v29 = vpop.f32.mrb[3].mxu0  ;;  %v518_v37 = vmul.f32 %v1262_v27, %v453_v20  ;;  %v513_v20 = vpop.permute.xlu1 %512  ;;  %v704_v27 = vld [vmem:[%s1995_s2 + $0x28] sm:$0xff] }
 0x153   :  { %v516_v31 = vmul.f32 %v443_v19, %v308_v29  ;;  %1307 = vmatprep.mubr.f32.mxu1 %v515_v28  ;;  %v705_v28 = vld [vmem:[%s1995_s2 + $0x30] sm:$0xff]  ;;  %v706_v29 = vld [vmem:[%s1995_s2 + $0x38] sm:$0xff] }
 0x155   :  { %1308 = vmatmul.mubr.f32.vlgmr.msra.gmra.mrb[0].mxu1 %v516_v31  ;;  %v708_v31 = vld [vmem:[%s1995_s2 + $0x48] sm:$0xff] }
 0x156   :  { %1478 = vmatpush3.bf16.msra.mxu1 %v1475_v59  ;;  %1310 = vmatprep.mubr.f32.mxu1 %v517_v33  ;;  %v726_v59 = vld [vmem:[#allocation9 + $0x58] sm:$0xff] }
 0x157   :  { %v1265_v38 = vpop.f32.mrb[4].mxu0  ;;  %1480 = vmatprep.subr.bf16.mxu1 %v1479_v32  ;;  %v1495_v1 = vpack.c.bf16 %v726_v59, %v725_v58  ;;  %v710_v33 = vld [vmem:[%s1995_s2 + $0x58] sm:$0xff] }
 0x158   :  { %v321_v40 = vpop.f32.mrb[5].mxu0  ;;  %v521_v50 = vmul.f32 %v1265_v38, %v468_v30  ;;  %v707_v30 = vld [vmem:[%s1995_s2 + $0x40] sm:$0xff]  ;;  %v922_v38 = vld [vmem:[#allocation11 + $0x70] sm:$0xff] }
 0x159   :  { %v519_v44 = vmul.f32 %v458_v21, %v321_v40  ;;  %v1266_v45 = vpop.f32.mrb[6].mxu0  ;;  %1311 = vmatmul.mubr.f32.gmra.mrb[2].mxu1 %v518_v37  ;;  %v714_v37 = vld [vmem:[%s1995_s2 + $0x78] sm:$0xff] }
 0x15a   :  { %1482 = vmatpush3.bf16.msra.mxu1 %v1479_v32  ;;  %v324_v46 = vpop.f32.mrb[7].mxu0  ;;  %v522_v54 = vmul.f32 %v1266_v45, %v473_v36  ;;  %v709_v32 = vld [vmem:[%s1995_s2 + $0x50] sm:$0xff] }
 0x15b   :  { %v520_v47 = vmul.f32 %v463_v23, %v324_v46  ;;  %1313 = vmatprep.mubr.f32.mxu1 %v519_v44  ;;  %1484 = vmatprep.subr.bf16.mxu1 %v1483_v39  ;;  %v700_v23 = vld [vmem:[%s1995_s2 + $0x8] sm:$0xff]  ;;  %v713_v36 = vld [vmem:[%s1995_s2 + $0x70] sm:$0xff] }
 0x15d   :  { %1314 = vmatmul.mubr.f32.gmra.mrb[4].mxu1 %v520_v47 }
 0x15e   :  { %1486 = vmatpush3.bf16.msra.mxu1 %v1483_v39  ;;  %1316 = vmatprep.mubr.f32.mxu1 %v521_v50  ;;  %v923_v39 = vld [vmem:[#allocation11 + $0x78] sm:$0xff] }
 0x15f   :  { %v1269_v55 = vpop.f32.mrb[8].mxu0  ;;  %1488 = vmatprep.subr.bf16.mxu1 %v1487_v48  ;;  %v1535_v40 = vpack.c.bf16 %v923_v39, %v922_v38 }
 0x160   :  { %v337_v57 = vpop.f32.mrb[9].mxu0  ;;  %v525_v2 = vmul.f32 %v1269_v55, %v488_v53 }
 0x161   :  { %v523_v60 = vmul.f32 %v478_v43, %v337_v57  ;;  %v1270_v61 = vpop.f32.mrb[10].mxu0  ;;  %1317 = vmatmul.mubr.f32.gmra.mrb[6].mxu1 %v522_v54  ;;  %1536 = vmatprep.subr.bf16.mxu0 %v1535_v40 }
 0x162   :  { %1490 = vmatpush3.bf16.msra.mxu1 %v1487_v48  ;;  %v340_v63 = vpop.f32.mrb[11].mxu0  ;;  %v526_v6 = vmul.f32 %v1270_v61, %v493_v62  ;;  %1538 = vmatpush3.bf16.msra.mxu0 %v1535_v40 }
 0x163   :  { %v524_v0 = vmul.f32 %v483_v49, %v340_v63  ;;  %1319 = vmatprep.mubr.f32.mxu1 %v523_v60  ;;  %1492 = vmatprep.subr.bf16.mxu1 %v1491_v56 }
 0x165   :  { %1320 = vmatmul.mubr.f32.gmra.mrb[8].mxu1 %v524_v0 }
 0x166   :  { %1494 = vmatpush3.bf16.msra.mxu1 %v1491_v56  ;;  %1322 = vmatprep.mubr.f32.mxu1 %v525_v2 }
 0x167   :  { %v1273_v7 = vpop.f32.mrb[12].mxu0  ;;  %1496 = vmatprep.subr.bf16.mxu1 %v1495_v1 }
 0x168   :  { %v353_v10 = vpop.f32.mrb[13].mxu0  ;;  %v529_v19 = vmul.f32 %v1273_v7, %v508_v16 }
 0x169   :  { %v527_v13 = vmul.f32 %v498_v5, %v353_v10  ;;  %v1274_v14 = vpop.f32.mrb[14].mxu0  ;;  %1323 = vmatmul.mubr.f32.gmra.mrb[10].mxu1 %v526_v6 }
 0x16a   :  { %1498 = vmatpush3.bf16.msra.mxu1 %v1495_v1  ;;  %v356_v15 = vpop.f32.mrb[15].mxu0  ;;  %v530_v21 = vmul.f32 %v1274_v14, %v513_v20 }
 0x16b   :  { %v528_v17 = vmul.f32 %v503_v9, %v356_v15  ;;  %1325 = vmatprep.mubr.f32.mxu1 %v527_v13  ;;  %1500 = vmatprep.subr.bf16.mxu1 %v1499_v8 }
 0x16d   :  { %1326 = vmatmul.mubr.f32.gmra.mrb[12].mxu1 %v528_v17 }
 0x16e   :  { %1502 = vmatpush3.bf16.msra.mxu1 %v1499_v8  ;;  %1328 = vmatprep.mubr.f32.mxu1 %v529_v19 }
 0x16f   :  { %1504 = vmatprep.subr.bf16.mxu1 %v1503_v18 }
 0x171   :  { %1329 = vmatmul.mubr.f32.gmra.mrb[14].mxu1 %v530_v21 }
 0x172   :  { %1506 = vmatpush3.bf16.msra.mxu1 %v1503_v18  ;;  %1363 = vmatprep.mubr.f32.mxu1 %v699_v22 }
 0x175   :  { %1364 = vmatmul.mubr.f32.vlgmr.msra.gmra.mrb[0].mxu1 %v700_v23 }
 0x176   :  { %1366 = vmatprep.mubr.f32.mxu1 %v701_v24 }
 0x179   :  { %1367 = vmatmul.mubr.f32.gmra.mrb[2].mxu1 %v702_v25 }
 0x17a   :  { %1369 = vmatprep.mubr.f32.mxu1 %v703_v26  ;;  %v1130_v26 = vld [vmem:[%s2001_s8] ss:$0 sm:$0xff]  ;;  %s1750_s8 = smov [#allocation12]  }
 0x17b   :  { %s1097_s23 = sshll.u32 %s1750_s8, 4  ;;  %s1098_s23 = int_to_ptr.vmem [resolvable:$true] %s1097_s23 }
 0x17c   :  { %s1710_s25 = scalar_lea.vmem %s1098_s23, 2048  ;;  %p1715_p13 = scmp.lt.s32.totalorder %s1098_s23, %s1098_s23 }
 0x17d   :  { %1370 = vmatmul.mubr.f32.gmra.mrb[4].mxu1 %v704_v27  ;;  %p1711_p12 = scmp.ne.s32.totalorder %s1098_s23, %s1710_s25  ;;  %p1716_p0 = scmp.lt.s32.totalorder %s1710_s25, %s1710_s25 }
 0x17e   :  { %1372 = vmatprep.mubr.f32.mxu1 %v705_v28 }
 0x17f   :  { %p1717_p1 = por %p1716_p0, %p1715_p13 }
 0x181   :  { %1373 = vmatmul.mubr.f32.gmra.mrb[6].mxu1 %v706_v29  ;;  %p1718_p2 = pnand %p1717_p1, %p1711_p12 }
 0x182   :  { %1375 = vmatprep.mubr.f32.mxu1 %v707_v30 }
 0x185   :  { %1376 = vmatmul.mubr.f32.gmra.mrb[8].mxu1 %v708_v31 }
 0x186   :  { %1378 = vmatprep.mubr.f32.mxu1 %v709_v32 }
 0x189   :  { %1379 = vmatmul.mubr.f32.gmra.mrb[10].mxu1 %v710_v33 }
 0x18a   :  { %1381 = vmatprep.mubr.f32.mxu1 %v711_v34 }
 0x18d   :  { %1382 = vmatmul.mubr.f32.gmra.mrb[12].mxu1 %v712_v35 }
 0x18e   :  { %1384 = vmatprep.mubr.f32.mxu1 %v713_v36 }
 0x191   :  { %1385 = vmatmul.mubr.f32.gmra.mrb[14].mxu1 %v714_v37 }
 0x248   :  { %v1365_v42 = vpop.f32.mrb[0].mxu1 }
 0x249   :  { %v1539_v43 = vadd.f32 %v1365_v42, %v1129_v41  ;;  %v797_v44 = vpop.f32.mrb[1].mxu1 }
 0x24a   :  { %v1540_v45 = vadd.f32 %v1129_v41, %v797_v44 }
 0x24b   :  { %v893_v48 = vmax.f32 %v1539_v43, 0.0 }
 0x24c   :  { %v892_v46 = vmax.f32 %v1540_v45, 0.0  ;;  %v1368_v47 = vpop.f32.mrb[2].mxu1 }
 0x24d   :  { %v1541_v49 = vadd.f32 %v1368_v47, %v1129_v41  ;;  %v807_v50 = vpop.f32.mrb[3].mxu1 }
 0x24e   :  { %v1542_v51 = vadd.f32 %v1129_v41, %v807_v50  ;;  %1419 = vmatprep.mubr.f32.mxu0 %v892_v46 }
 0x24f   :  { %1420 = vmatmul.mubr.f32.vlgmr.msra.gmra.mrb[16].mxu0 %v893_v48  ;;  %v895_v54 = vmax.f32 %v1541_v49, 0.0 }
 0x250   :  { %v894_v52 = vmax.f32 %v1542_v51, 0.0  ;;  %v1371_v53 = vpop.f32.mrb[4].mxu1 }
 0x251   :  { %v1543_v55 = vadd.f32 %v1371_v53, %v1129_v41  ;;  %v817_v56 = vpop.f32.mrb[5].mxu1 }
 0x252   :  { %v1544_v57 = vadd.f32 %v1129_v41, %v817_v56  ;;  %1422 = vmatprep.mubr.f32.mxu0 %v894_v52 }
 0x253   :  { %1423 = vmatmul.mubr.f32.gmra.mrb[18].mxu0 %v895_v54  ;;  %v897_v60 = vmax.f32 %v1543_v55, 0.0 }
 0x254   :  { %v896_v58 = vmax.f32 %v1544_v57, 0.0  ;;  %v1374_v59 = vpop.f32.mrb[6].mxu1 }
 0x255   :  { %v1545_v61 = vadd.f32 %v1374_v59, %v1129_v41  ;;  %v827_v62 = vpop.f32.mrb[7].mxu1 }
 0x256   :  { %v1546_v63 = vadd.f32 %v1129_v41, %v827_v62  ;;  %1425 = vmatprep.mubr.f32.mxu0 %v896_v58 }
 0x257   :  { %1426 = vmatmul.mubr.f32.gmra.mrb[20].mxu0 %v897_v60  ;;  %v899_v2 = vmax.f32 %v1545_v61, 0.0 }
 0x258   :  { %v898_v0 = vmax.f32 %v1546_v63, 0.0  ;;  %v1377_v1 = vpop.f32.mrb[8].mxu1 }
 0x259   :  { %v1547_v3 = vadd.f32 %v1377_v1, %v1129_v41  ;;  %v837_v4 = vpop.f32.mrb[9].mxu1 }
 0x25a   :  { %v1548_v5 = vadd.f32 %v1129_v41, %v837_v4  ;;  %1428 = vmatprep.mubr.f32.mxu0 %v898_v0 }
 0x25b   :  { %1429 = vmatmul.mubr.f32.gmra.mrb[22].mxu0 %v899_v2  ;;  %v901_v8 = vmax.f32 %v1547_v3, 0.0 }
 0x25c   :  { %v900_v6 = vmax.f32 %v1548_v5, 0.0  ;;  %v1380_v7 = vpop.f32.mrb[10].mxu1 }
 0x25d   :  { %v1549_v9 = vadd.f32 %v1380_v7, %v1129_v41  ;;  %v847_v10 = vpop.f32.mrb[11].mxu1 }
 0x25e   :  { %v1550_v11 = vadd.f32 %v1129_v41, %v847_v10  ;;  %1431 = vmatprep.mubr.f32.mxu0 %v900_v6 }
 0x25f   :  { %1432 = vmatmul.mubr.f32.gmra.mrb[24].mxu0 %v901_v8  ;;  %v903_v14 = vmax.f32 %v1549_v9, 0.0 }
 0x260   :  { %v902_v12 = vmax.f32 %v1550_v11, 0.0  ;;  %v1383_v13 = vpop.f32.mrb[12].mxu1 }
 0x261   :  { %v1551_v15 = vadd.f32 %v1383_v13, %v1129_v41  ;;  %v857_v16 = vpop.f32.mrb[13].mxu1 }
 0x262   :  { %v1552_v17 = vadd.f32 %v1129_v41, %v857_v16  ;;  %1434 = vmatprep.mubr.f32.mxu0 %v902_v12 }
 0x263   :  { %1435 = vmatmul.mubr.f32.gmra.mrb[26].mxu0 %v903_v14  ;;  %v905_v20 = vmax.f32 %v1551_v15, 0.0 }
 0x264   :  { %v904_v18 = vmax.f32 %v1552_v17, 0.0  ;;  %v1386_v19 = vpop.f32.mrb[14].mxu1 }
 0x265   :  { %v1553_v21 = vadd.f32 %v1386_v19, %v1129_v41  ;;  %v867_v22 = vpop.f32.mrb[15].mxu1 }
 0x266   :  { %v1554_v23 = vadd.f32 %v1129_v41, %v867_v22  ;;  %1437 = vmatprep.mubr.f32.mxu0 %v904_v18 }
 0x267   :  { %1438 = vmatmul.mubr.f32.gmra.mrb[28].mxu0 %v905_v20  ;;  %v907_v25 = vmax.f32 %v1553_v21, 0.0 }
 0x268   :  { %v906_v24 = vmax.f32 %v1554_v23, 0.0 }
 0x26a   :  { %1440 = vmatprep.mubr.f32.mxu0 %v906_v24 }
 0x26b   :  { %1441 = vmatmul.mubr.f32.gmra.mrb[30].mxu0 %v907_v25 }
 0x322   :  { %v1421_v27 = vpop.f32.mrb[16].mxu0 }
 0x323   :  { %v1003_v28 = vadd.f32 %v1421_v27, %v1130_v26  ;;  %v997_v29 = vpop.f32.mrb[17].mxu0 }
 0x324   :  { %v998_v30 = vadd.f32 %v1130_v26, %v997_v29 }
 0x325   :  { %1077 = vst [vmem:[#allocation12 + $0x8] sm:$0xff] %v1003_v28 }
 0x326   :  { %1076 = vst [vmem:[#allocation12] sm:$0xff] %v998_v30  ;;  %v1424_v31 = vpop.f32.mrb[18].mxu0 }
 0x327   :  { %v1013_v32 = vadd.f32 %v1424_v31, %v1130_v26  ;;  %v1007_v33 = vpop.f32.mrb[19].mxu0 }
 0x328   :  { %v1008_v34 = vadd.f32 %v1130_v26, %v1007_v33 }
 0x329   :  { %1079 = vst [vmem:[#allocation12 + $0x18] sm:$0xff] %v1013_v32 }
 0x32a   :  { %1078 = vst [vmem:[#allocation12 + $0x10] sm:$0xff] %v1008_v34  ;;  %v1427_v35 = vpop.f32.mrb[20].mxu0 }
 0x32b   :  { %v1023_v36 = vadd.f32 %v1427_v35, %v1130_v26  ;;  %v1017_v37 = vpop.f32.mrb[21].mxu0 }
 0x32c   :  { %v1018_v38 = vadd.f32 %v1130_v26, %v1017_v37 }
 0x32d   :  { %1081 = vst [vmem:[#allocation12 + $0x28] sm:$0xff] %v1023_v36 }
 0x32e   :  { %1080 = vst [vmem:[#allocation12 + $0x20] sm:$0xff] %v1018_v38  ;;  %v1430_v39 = vpop.f32.mrb[22].mxu0 }
 0x32f   :  { %v1033_v40 = vadd.f32 %v1430_v39, %v1130_v26  ;;  %v1027_v41 = vpop.f32.mrb[23].mxu0 }
 0x330   :  { %v1028_v42 = vadd.f32 %v1130_v26, %v1027_v41 }
 0x331   :  { %1083 = vst [vmem:[#allocation12 + $0x38] sm:$0xff] %v1033_v40 }
 0x332   :  { %1082 = vst [vmem:[#allocation12 + $0x30] sm:$0xff] %v1028_v42  ;;  %v1433_v43 = vpop.f32.mrb[24].mxu0 }
 0x333   :  { %v1043_v44 = vadd.f32 %v1433_v43, %v1130_v26  ;;  %v1037_v45 = vpop.f32.mrb[25].mxu0 }
 0x334   :  { %v1038_v46 = vadd.f32 %v1130_v26, %v1037_v45 }
 0x335   :  { %1085 = vst [vmem:[#allocation12 + $0x48] sm:$0xff] %v1043_v44 }
 0x336   :  { %1084 = vst [vmem:[#allocation12 + $0x40] sm:$0xff] %v1038_v46  ;;  %v1436_v47 = vpop.f32.mrb[26].mxu0 }
 0x337   :  { %v1053_v48 = vadd.f32 %v1436_v47, %v1130_v26  ;;  %v1047_v49 = vpop.f32.mrb[27].mxu0 }
 0x338   :  { %v1048_v50 = vadd.f32 %v1130_v26, %v1047_v49 }
 0x339   :  { %1087 = vst [vmem:[#allocation12 + $0x58] sm:$0xff] %v1053_v48 }
 0x33a   :  { %1086 = vst [vmem:[#allocation12 + $0x50] sm:$0xff] %v1048_v50  ;;  %v1439_v51 = vpop.f32.mrb[28].mxu0 }
 0x33b   :  { %v1063_v52 = vadd.f32 %v1439_v51, %v1130_v26  ;;  %v1057_v53 = vpop.f32.mrb[29].mxu0 }
 0x33c   :  { %v1058_v54 = vadd.f32 %v1130_v26, %v1057_v53 }
 0x33d   :  { %1089 = vst [vmem:[#allocation12 + $0x68] sm:$0xff] %v1063_v52 }
 0x33e   :  { %1088 = vst [vmem:[#allocation12 + $0x60] sm:$0xff] %v1058_v54  ;;  %v1442_v55 = vpop.f32.mrb[30].mxu0 }
 0x33f   :  { %v1073_v56 = vadd.f32 %v1442_v55, %v1130_v26  ;;  %v1067_v57 = vpop.f32.mrb[31].mxu0 }
 0x340   :  { %v1068_v58 = vadd.f32 %v1130_v26, %v1067_v57 }
 0x341   :  { %1091 = vst [vmem:[#allocation12 + $0x78] sm:$0xff] %v1073_v56 }
 0x342   :  { %1090 = vst [vmem:[#allocation12 + $0x70] sm:$0xff] %v1068_v58 }
 0x343   :  { %1721 = shalt.err (!%p1718_p2)
}
 0x344   :  { %s1722_s6 = scalar_lea.hbm %s2002_s9, 2048 }
 0x345   :  { %p1723_p3 = scmp.ne.s32.totalorder %s2002_s9, %s1722_s6  ;;  %p1726_p4 = scmp.lt.u32.totalorder %s1722_s6, %s2002_s9 }
 0x347   :  { %p1728_p5 = pnand %p1726_p4, %p1723_p3 }
 0x349   :  { %1731 = shalt.err (!%p1728_p5)
}
 0x34a   :  { %1103 = dma.vmem_to_hbm [thread:$0]  %s1098_s23, 2048, %s2002_s9, [#allocation5], %s1745_s10, %s1745_s10, %s1746_s14  }
 0x34b   :  { %1738 = dma.done.wait [#allocation5], 2048  }
 0x34c   :  { %1739 = vsyncadd [#allocation5], 4294965248 }
 0x34d   :  { %1107 = vsyncpa [#allocation4], 1 }
 0x34e   :  { %1108 = vsyncpa [#allocation7], 1 }
 0x34f   :  { %1109 = vsyncpa [#allocation10], 1 }
 0x350   :  { %1110 = vsyncpa [#allocation5], 1 }

</bundles_post_ra>
